<compile_context>
chip_gen: v5e
topology: v5e:2x2
jax: 0.10.0
libtpu: 0.0.40
codegen_flags: <defaults>
</compile_context>

<pallas_src>
import functools

import jax
import jax.numpy as jnp
from jax.experimental import pallas as pl
from jax.experimental.pallas import tpu as pltpu


def _ctdet_loss_kernel(pred_ref, tgt_ref, pt_ref, nopt_ref):
    """pred_ref/tgt_ref: [TR, LANE] tiles; pt_ref/nopt_ref: resident (1,1) f32."""
    i = pl.program_id(0)           # row-tile index (outer)
    s = pl.program_id(1)           # stack index (inner)

    @pl.when((i == 0) & (s == 0))
    def _init():
        pt_ref[...] = jnp.zeros_like(pt_ref)
        nopt_ref[...] = jnp.zeros_like(nopt_ref)

    p = pred_ref[...].astype(jnp.float32)      # [TR, LANE]
    t = tgt_ref[...].astype(jnp.float32)       # [TR, LANE]

    # Strength-reduced: pt = p*t ; d = pt - t ; n = p - pt == p*(1-t)
    pt = p * t
    d = pt - t
    n = p - pt

    # Per-step full reduce (VALU tree + one XLU cross-lane reduce) is hidden
    # under the block DMA; accumulate into the VMEM-resident (1,1) outputs.
    pt_ref[...] += jnp.sum(d * d)
    nopt_ref[...] += jnp.sum(n * n)


def _pick_layout(n_elems, itemsize, *, target_block_bytes=2 << 20, min_tiles=4,
                 lane=None, tile_rows=None):
    """Flatten n_elems into [rows, lane] and pick a row tile.

    lane: multiple of 128 dividing n_elems (pref. 512), else full extent.
    tile_rows: largest divisor of rows that is a multiple of 8 (or == rows),
    targeting ~target_block_bytes per block but trying to keep >= min_tiles
    grid steps without shrinking blocks below ~1 MiB.
    """
    if lane is None:
        lane = next((c for c in (512, 256, 128) if n_elems % c == 0), n_elems)
    assert n_elems % lane == 0
    rows = n_elems // lane

    if tile_rows is None:
        budget_rows = max(1, target_block_bytes // (lane * itemsize))
        floor_rows = max(1, (1 << 20) // (lane * itemsize))
        want = min(rows, budget_rows)
        if rows // max(want, 1) < min_tiles:
            want = min(rows, max(floor_rows, rows // min_tiles, 1))
        legal = [d for d in range(1, rows + 1)
                 if rows % d == 0 and (d % 8 == 0 or d == rows)]
        fits = [d for d in legal if d <= want]
        tile_rows = fits[-1] if fits else legal[0]

    assert rows % tile_rows == 0
    return lane, rows, tile_rows


@functools.partial(jax.jit, static_argnames=("num_stacks", "lane", "tile_rows"))
def pln_ctdet_loss(ct_preds, ct_target, *, num_stacks, ct_pt_weight,
                   ct_nopt_weight, lane=None, tile_rows=None):
    """ct_preds: [S, B, H, W, K] (only channel 0 used); ct_target: [B, H, W]."""
    S, B, H, W, _K = ct_preds.shape
    assert S == num_stacks
    N = B * H * W

    lane, rows, tr = _pick_layout(
        N, jnp.dtype(ct_preds.dtype).itemsize, lane=lane, tile_rows=tile_rows)
    num_tiles = rows // tr

    # Channel-0 slice + free reshape to a sublane/lane-dense [S, rows, lane]
    # slab.  allow_input_fusion below lets XLA fuse this into the operand DMA
    # instead of round-tripping an extra copy through HBM.
    pred_slab = ct_preds[..., 0].reshape(S, rows, lane)   # native dtype
    tgt_slab = ct_target.reshape(rows, lane)              # native dtype

    cost = pl.CostEstimate(
        flops=7 * S * N,
        transcendentals=0,
        bytes_accessed=(pred_slab.size * pred_slab.dtype.itemsize
                        + tgt_slab.size * tgt_slab.dtype.itemsize + 8),
    )

    pt_part, nopt_part = pl.pallas_call(
        _ctdet_loss_kernel,
        out_shape=(jax.ShapeDtypeStruct((1, 1), jnp.float32),
                   jax.ShapeDtypeStruct((1, 1), jnp.float32)),
        grid_spec=pltpu.PrefetchScalarGridSpec(
            num_scalar_prefetch=0,
            grid=(num_tiles, S),                         # stack axis innermost
            in_specs=[
                # per-stack, per-row-tile prediction block
                pl.BlockSpec((None, tr, lane), lambda i, s: (s, i, 0)),
                # shared target: indexed only by the row-tile axis -> resident
                # across the inner stack loop (DMA'd once per row tile)
                pl.BlockSpec((tr, lane), lambda i, s: (i, 0)),
            ],
            # Constant block index over the whole grid -> VMEM-resident
            # accumulators, single HBM writeback at grid end.
            out_specs=[pl.BlockSpec((1, 1), lambda i, s: (0, 0)),
                       pl.BlockSpec((1, 1), lambda i, s: (0, 0))],
        ),
        compiler_params=pltpu.CompilerParams(
            dimension_semantics=("arbitrary", "arbitrary"),
            allow_input_fusion=[True, True],
        ),
        cost_estimate=cost,
    )(pred_slab, tgt_slab)

    ct_pt_loss = pt_part[0, 0] / num_stacks
    ct_nopt_loss = nopt_part[0, 0] / num_stacks
    ct_exist_loss = ct_pt_weight * ct_pt_loss + ct_nopt_weight * ct_nopt_loss

    loss = ct_exist_loss
    loss_stats = {
        "ct_exist_loss": ct_exist_loss,
        "ct_pt_loss": ct_pt_loss,
        "ct_nopt_loss": ct_nopt_loss,
    }
    return loss, loss_stats


def _reference(ct_preds, ct_target, num_stacks, ct_pt_weight, ct_nopt_weight):
    tgt = ct_target.astype(jnp.float32)
    ct_pt_loss = 0.0
    ct_nopt_loss = 0.0
    for s in range(num_stacks):
        pred = ct_preds[s, ..., 0].astype(jnp.float32)
        pt = pred * tgt
        nopt = pred * (1.0 - tgt)
        ct_pt_loss += jnp.sum((pt - tgt) ** 2) / num_stacks
        ct_nopt_loss += jnp.sum(nopt ** 2) / num_stacks
    ct_exist_loss = ct_pt_weight * ct_pt_loss + ct_nopt_weight * ct_nopt_loss
    return ct_exist_loss, ct_pt_loss, ct_nopt_loss


if __name__ == "__main__":
    # Synthetic opt config (deterministic, in-script).
    ct_pt_weight = 1.0
    ct_nopt_weight = 0.5

    key = jax.random.PRNGKey(0)

    # (num_stacks, B, H, W, K, lane override, tile_rows override)
    cases = [
        (2, 2, 16, 16, 2, None, None),   # auto layout: single (1, 512) block
        (3, 2, 32, 32, 3, 128, 8),       # multi-tile + multi-stack path
    ]

    for num_stacks, B, H, W, K, lane, tile_rows in cases:
        key, k_pred, k_tgt = jax.random.split(key, 3)
        # outputs[s]['ct'] : [B, H, W, K]  (stacked along leading stack axis)
        ct_preds = jax.random.uniform(
            k_pred, (num_stacks, B, H, W, K), dtype=jnp.float32)
        # batch['ct'] : [B, H, W]  -- binary center map
        ct_target = (jax.random.uniform(k_tgt, (B, H, W)) > 0.9).astype(jnp.float32)

        ref_loss, ref_pt, ref_nopt = _reference(
            ct_preds, ct_target, num_stacks, ct_pt_weight, ct_nopt_weight)

        loss, stats = pln_ctdet_loss(
            ct_preds, ct_target,
            num_stacks=num_stacks,
            ct_pt_weight=ct_pt_weight,
            ct_nopt_weight=ct_nopt_weight,
            lane=lane, tile_rows=tile_rows,
        )
        loss = jax.block_until_ready(loss)

        assert jnp.allclose(loss, ref_loss, rtol=1e-5, atol=1e-5)
        assert jnp.allclose(stats["ct_pt_loss"], ref_pt, rtol=1e-5, atol=1e-5)
        assert jnp.allclose(stats["ct_nopt_loss"], ref_nopt, rtol=1e-5, atol=1e-5)

    print("KERNEL_OK")
</pallas_src>

<mosaic_0001>
module attributes {stable_mosaic.version = 11 : i64} {
  func.func @_ctdet_loss_kernel(%arg0: i32, %arg1: i32, %arg2: memref<1x1x512xf32, #tpu.memory_space<vmem>>, %arg3: memref<1x512xf32, #tpu.memory_space<vmem>>, %arg4: memref<1x1xf32, #tpu.memory_space<vmem>>, %arg5: memref<1x1xf32, #tpu.memory_space<vmem>>) attributes {dimension_semantics = [#tpu.dimension_semantics<arbitrary>, #tpu.dimension_semantics<arbitrary>], iteration_bounds = array<i64: 1, 2>, scalar_prefetch = 0 : i64, scratch_operands = 0 : i64, tpu.core_type = #tpu.core_type<tc>, window_params = [{transform_indices = @transform_0, window_bounds = array<i64: 1, 1, 512>}, {transform_indices = @transform_1, window_bounds = array<i64: 1, 512>}, {pipeline_mode = #tpu.pipeline_mode<synchronous>, transform_indices = @transform_2, window_bounds = array<i64: 1, 1>}, {pipeline_mode = #tpu.pipeline_mode<synchronous>, transform_indices = @transform_3, window_bounds = array<i64: 1, 1>}]} {
    %c0_i32 = arith.constant 0 : i32
    %0 = arith.cmpi eq, %arg0, %c0_i32 : i32
    %c0_i32_0 = arith.constant 0 : i32
    %1 = arith.cmpi eq, %arg1, %c0_i32_0 : i32
    %2 = arith.andi %0, %1 : i1
    %3 = arith.extui %2 : i1 to i32
    %c0_i32_1 = arith.constant 0 : i32
    %4 = arith.cmpi ne, %3, %c0_i32_1 : i32
    scf.if %4 {
      %cst_15 = arith.constant 0.000000e+00 : f32
      %29 = vector.broadcast %cst_15 : f32 to vector<1x1xf32>
      %c0_16 = arith.constant 0 : index
      %c0_17 = arith.constant 0 : index
      %30 = vector.load %arg4[%c0_16, %c0_17] : memref<1x1xf32, #tpu.memory_space<vmem>>, vector<1x1xf32>
      tpu.vector_store %arg4[%c0_16, %c0_17], %29 {strides = array<i32>} : memref<1x1xf32, #tpu.memory_space<vmem>>, vector<1x1xf32>,
      %cst_18 = arith.constant 0.000000e+00 : f32
      %31 = vector.broadcast %cst_18 : f32 to vector<1x1xf32>
      %c0_19 = arith.constant 0 : index
      %c0_20 = arith.constant 0 : index
      %32 = vector.load %arg5[%c0_19, %c0_20] : memref<1x1xf32, #tpu.memory_space<vmem>>, vector<1x1xf32>
      tpu.vector_store %arg5[%c0_19, %c0_20], %31 {strides = array<i32>} : memref<1x1xf32, #tpu.memory_space<vmem>>, vector<1x1xf32>,
    } else {
    }
    %c0 = arith.constant 0 : index
    %c0_2 = arith.constant 0 : index
    %c0_3 = arith.constant 0 : index
    %5 = vector.load %arg2[%c0, %c0_2, %c0_3] : memref<1x1x512xf32, #tpu.memory_space<vmem>>, vector<1x1x512xf32>
    %6 = vector.shape_cast %5 : vector<1x1x512xf32> to vector<1x512xf32>
    %c0_4 = arith.constant 0 : index
    %c0_5 = arith.constant 0 : index
    %7 = vector.load %arg3[%c0_4, %c0_5] : memref<1x512xf32, #tpu.memory_space<vmem>>, vector<1x512xf32>
    %8 = arith.mulf %6, %7 : vector<1x512xf32>
    %9 = arith.subf %8, %7 : vector<1x512xf32>
    %10 = arith.subf %6, %8 : vector<1x512xf32>
    %c0_6 = arith.constant 0 : index
    %c0_7 = arith.constant 0 : index
    %11 = vector.load %arg4[%c0_6, %c0_7] : memref<1x1xf32, #tpu.memory_space<vmem>>, vector<1x1xf32>
    %12 = arith.mulf %9, %9 : vector<1x512xf32>
    %13 = vector.shape_cast %12 : vector<1x512xf32> to vector<1x1x512xf32>
    %cst = arith.constant dense<0.000000e+00> : vector<1xf32>
    %14 = vector.multi_reduction <add>, %13, %cst [1, 2] : vector<1x1x512xf32> to vector<1xf32>
    %15 = vector.shape_cast %14 : vector<1xf32> to vector<1x1x1xf32>
    %16 = vector.extract %15[0, 0, 0] : f32 from vector<1x1x1xf32>
    %17 = vector.broadcast %16 : f32 to vector<1x1xf32>
    %18 = arith.addf %11, %17 : vector<1x1xf32>
    %c0_8 = arith.constant 0 : index
    %c0_9 = arith.constant 0 : index
    %19 = vector.load %arg4[%c0_8, %c0_9] : memref<1x1xf32, #tpu.memory_space<vmem>>, vector<1x1xf32>
    tpu.vector_store %arg4[%c0_8, %c0_9], %18 {strides = array<i32>} : memref<1x1xf32, #tpu.memory_space<vmem>>, vector<1x1xf32>,
    %c0_10 = arith.constant 0 : index
    %c0_11 = arith.constant 0 : index
    %20 = vector.load %arg5[%c0_10, %c0_11] : memref<1x1xf32, #tpu.memory_space<vmem>>, vector<1x1xf32>
    %21 = arith.mulf %10, %10 : vector<1x512xf32>
    %22 = vector.shape_cast %21 : vector<1x512xf32> to vector<1x1x512xf32>
    %cst_12 = arith.constant dense<0.000000e+00> : vector<1xf32>
    %23 = vector.multi_reduction <add>, %22, %cst_12 [1, 2] : vector<1x1x512xf32> to vector<1xf32>
    %24 = vector.shape_cast %23 : vector<1xf32> to vector<1x1x1xf32>
    %25 = vector.extract %24[0, 0, 0] : f32 from vector<1x1x1xf32>
    %26 = vector.broadcast %25 : f32 to vector<1x1xf32>
    %27 = arith.addf %20, %26 : vector<1x1xf32>
    %c0_13 = arith.constant 0 : index
    %c0_14 = arith.constant 0 : index
    %28 = vector.load %arg5[%c0_13, %c0_14] : memref<1x1xf32, #tpu.memory_space<vmem>>, vector<1x1xf32>
    tpu.vector_store %arg5[%c0_13, %c0_14], %27 {strides = array<i32>} : memref<1x1xf32, #tpu.memory_space<vmem>>, vector<1x1xf32>,
    return
  }
  func.func @transform_0(%arg0: i32, %arg1: i32) -> (i32, i32, i32) {
    %c0_i32 = arith.constant 0 : i32
    %c0_i32_0 = arith.constant 0 : i32
    return %arg1, %arg0, %c0_i32 : i32, i32, i32
  }
  func.func @transform_1(%arg0: i32, %arg1: i32) -> (i32, i32) {
    %c0_i32 = arith.constant 0 : i32
    %c0_i32_0 = arith.constant 0 : i32
    return %arg0, %c0_i32 : i32, i32
  }
  func.func @transform_2(%arg0: i32, %arg1: i32) -> (i32, i32) {
    %c0_i32 = arith.constant 0 : i32
    %c0_i32_0 = arith.constant 0 : i32
    %c0_i32_1 = arith.constant 0 : i32
    return %c0_i32, %c0_i32_0 : i32, i32
  }
  func.func @transform_3(%arg0: i32, %arg1: i32) -> (i32, i32) {
    %c0_i32 = arith.constant 0 : i32
    %c0_i32_0 = arith.constant 0 : i32
    %c0_i32_1 = arith.constant 0 : i32
    return %c0_i32, %c0_i32_0 : i32, i32
  }
}

</mosaic_0001>

<bundles_post_ra>
// kernel: squeeze.0
= control target key start
LH: loop header
LB: loop body
LE: loop exit
PB: predicated region body
PF: predicated region fallthrough
CT: control target
= control target key end

     0   :  { %vm4_vm0 = vcmask 1047556   ;;  %s162_s14 = smov 112   ;;  %s163_s15 = smov 80   ;;  %vm6_vm1 = vcmask 130048   ;;  %vm17_vm2 = vcmask 1048448   ;;  %vm28_vm3 = vcmask 917248   ;;  %s259_s0 = inlined_call_operand.vmem [shape: f32[2,2,16,16], index: 0, kind: input, shape index: {}]   ;;  %s260_s1 = inlined_call_operand.vmem [shape: f32[2,1,512], index: 1, kind: output, shape index: {}]  }
   0x1   :  { %v134_v0 = vld [vmem:[%s259_s0 + $0x7] ss:$8 sm:$0xf]   ;;  %v138_v2 = vld [vmem:[%s259_s0 + $0x5] ss:$8 sm:$0xf]  }
   0x2   :  { %v135_v1 = vld [vmem:[%s259_s0 + $0x7] ss:$8 sm:$0xf0]   ;;  %v139_v4 = vld [vmem:[%s259_s0 + $0x5] ss:$8 sm:$0xf0]  }
   0x3   :  { %v14_v3 = vsel %vm4_vm0, %v135_v1, %v134_v0  ;;  %v36_v5 = vsel %vm4_vm0, %v139_v4, %v138_v2  ;;  %v136_v6 = vld [vmem:[%s259_s0 + $0x6] ss:$8 sm:$0xf]   ;;  %v140_v8 = vld [vmem:[%s259_s0 + $0x4] ss:$8 sm:$0xf]  }
   0x4   :  { %15 = vrot.lane.b32.xlu0 %v14_v3, %s162_s14  ;;  %37 = vrot.lane.b32.xlu1 %v36_v5, %s163_s15  ;;  %v137_v7 = vld [vmem:[%s259_s0 + $0x6] ss:$8 sm:$0xf0]   ;;  %v141_v9 = vld [vmem:[%s259_s0 + $0x4] ss:$8 sm:$0xf0]  }
   0x5   :  { %v142_v10 = vld [vmem:[%s259_s0 + $0x3] ss:$8 sm:$0xf]   ;;  %v25_v12 = vsel %vm4_vm0, %v137_v7, %v136_v6  ;;  %v47_v14 = vsel %vm4_vm0, %v141_v9, %v140_v8  ;;  %s164_s28 = smov 48   ;;  %s165_s29 = smov 96   ;;  %vm39_vm4 = vcmask 786048  }
   0x6   :  { %v143_v11 = vld [vmem:[%s259_s0 + $0x3] ss:$8 sm:$0xf0]   ;;  %v144_v15 = vld [vmem:[%s259_s0 + $0x2] ss:$8 sm:$0xf]  }
   0x7   :  { %v58_v13 = vsel %vm4_vm0, %v143_v11, %v142_v10  ;;  %v145_v16 = vld [vmem:[%s259_s0 + $0x2] ss:$8 sm:$0xf0]   ;;  %s166_s5 = smov 64   ;;  %s167_s10 = smov 32   ;;  %vm50_vm5 = vcmask 654848  }
   0x8   :  { %59 = vrot.lane.b32.xlu2 %v58_v13, %s164_s28  ;;  %v146_v17 = vld [vmem:[%s259_s0 + $0x1] ss:$8 sm:$0xf]   ;;  %v69_v19 = vsel %vm4_vm0, %v145_v16, %v144_v15  ;;  %s168_s11 = smov 16   ;;  %vm61_vm6 = vcmask 523648   ;;  %vm72_vm7 = vcmask 392448  }
   0x9   :  { %v147_v18 = vld [vmem:[%s259_s0 + $0x1] ss:$8 sm:$0xf0]   ;;  %v2_v21 = vld [vmem:[%s259_s0] ss:$8 sm:$0xf]  }
   0xa   :  { %v80_v20 = vsel %vm4_vm0, %v147_v18, %v146_v17  ;;  %v3_v22 = vld [vmem:[%s259_s0] ss:$8 sm:$0xf0]   ;;  %vm83_vm8 = vcmask 261248  }
   0xb   :  { %v5_v23 = vsel %vm4_vm0, %v3_v22, %v2_v21 }
   0xc   :  { %26 = vrot.lane.b32.xlu0 %v25_v12, %s165_s29  ;;  %48 = vrot.lane.b32.xlu1 %v47_v14, %s166_s5  ;;  %7 = vst.msk [vmem:[#allocation0] ss:$8 sm:$0xf] %vm6_vm1, %v5_v23  }
   0xd   :  { %8 = vst.msk [vmem:[#allocation0] ss:$8 sm:$0xf0] %vm6_vm1, %v5_v23  }
  0x10   :  { %70 = vrot.lane.b32.xlu2 %v69_v19, %s167_s10 }
  0x14   :  { %81 = vrot.lane.b32.xlu0 %v80_v20, %s168_s11 }
  0x62   :  { %v60_v24 = vpop.permute.xlu2 %59  }
  0x6a   :  { %v71_v25 = vpop.permute.xlu2 %70  }
  0x76   :  { %v16_v26 = vpop.permute.xlu0 %15   ;;  %v38_v27 = vpop.permute.xlu1 %37  }
  0x77   :  { %18 = vst.msk [vmem:[#allocation0] ss:$8 sm:$0xf] %vm17_vm2, %v16_v26  }
  0x78   :  { %19 = vst.msk [vmem:[#allocation0] ss:$8 sm:$0xf0] %vm17_vm2, %v16_v26  }
  0x7e   :  { %v27_v28 = vpop.permute.xlu0 %26   ;;  %v49_v29 = vpop.permute.xlu1 %48  }
  0x7f   :  { %29 = vst.msk [vmem:[#allocation0] ss:$8 sm:$0xf] %vm28_vm3, %v27_v28  }
  0x80   :  { %30 = vst.msk [vmem:[#allocation0] ss:$8 sm:$0xf0] %vm28_vm3, %v27_v28  }
  0x81   :  { %40 = vst.msk [vmem:[#allocation0] ss:$8 sm:$0xf] %vm39_vm4, %v38_v27  }
  0x82   :  { %41 = vst.msk [vmem:[#allocation0] ss:$8 sm:$0xf0] %vm39_vm4, %v38_v27  }
  0x83   :  { %51 = vst.msk [vmem:[#allocation0] ss:$8 sm:$0xf] %vm50_vm5, %v49_v29  }
  0x84   :  { %52 = vst.msk [vmem:[#allocation0] ss:$8 sm:$0xf0] %vm50_vm5, %v49_v29  }
  0x85   :  { %62 = vst.msk [vmem:[#allocation0] ss:$8 sm:$0xf] %vm61_vm6, %v60_v24  }
  0x86   :  { %63 = vst.msk [vmem:[#allocation0] ss:$8 sm:$0xf0] %vm61_vm6, %v60_v24   ;;  %v82_v30 = vpop.permute.xlu0 %81  }
  0x87   :  { %73 = vst.msk [vmem:[#allocation0] ss:$8 sm:$0xf] %vm72_vm7, %v71_v25  }
  0x88   :  { %74 = vst.msk [vmem:[#allocation0] ss:$8 sm:$0xf0] %vm72_vm7, %v71_v25  }
  0x89   :  { %84 = vst.msk [vmem:[#allocation0] ss:$8 sm:$0xf] %vm83_vm8, %v82_v30  }
  0x8a   :  { %85 = vst.msk [vmem:[#allocation0] ss:$8 sm:$0xf0] %vm83_vm8, %v82_v30  }
  0x90   :  { %v88_v31 = vld [vmem:[#allocation0] sm:$0x1]  ;;  %v93_v32 = vld [vmem:[#allocation0 + $0x8] sm:$0x1]  ;;  %v99_v33 = vld [vmem:[#allocation0 + $0x10] sm:$0x1] }
  0x91   :  { %91 = vst [vmem:[%s260_s1] sm:$0x1] %v88_v31  ;;  %v105_v34 = vld [vmem:[#allocation0 + $0x18] sm:$0x1]  ;;  %v111_v35 = vld [vmem:[#allocation0 + $0x20] sm:$0x1] }
  0x92   :  { %148 = vst [vmem:[%s260_s1 + $0x1] sm:$0x1] %v93_v32  ;;  %v117_v36 = vld [vmem:[#allocation0 + $0x28] sm:$0x1]  ;;  %v123_v37 = vld [vmem:[#allocation0 + $0x30] sm:$0x1] }
  0x93   :  { %149 = vst [vmem:[%s260_s1 + $0x2] sm:$0x1] %v99_v33  ;;  %v129_v38 = vld [vmem:[#allocation0 + $0x38] sm:$0x1] }
  0x94   :  { %150 = vst [vmem:[%s260_s1 + $0x3] sm:$0x1] %v105_v34 }
  0x95   :  { %151 = vst [vmem:[%s260_s1 + $0x4] sm:$0x1] %v111_v35 }
  0x96   :  { %152 = vst [vmem:[%s260_s1 + $0x5] sm:$0x1] %v117_v36 }
  0x97   :  { %153 = vst [vmem:[%s260_s1 + $0x6] sm:$0x1] %v123_v37 }
  0x98   :  { %154 = vst [vmem:[%s260_s1 + $0x7] sm:$0x1] %v129_v38 }

// kernel: pln_ctdet_loss.1
= control target key start
LH: loop header
LB: loop body
LE: loop exit
PB: predicated region body
PF: predicated region fallthrough
CT: control target
= control target key end

     0   :  { %9 = vsyncpa [#allocation3], 0  ;;  %s610_s0 = inlined_call_operand.vmem [shape: f32[2,1,512], index: 0, kind: input, shape index: {}]   ;;  %s611_s1 = inlined_call_operand.vmem [shape: f32[1,512], index: 1, kind: input, shape index: {}]   ;;  %s612_s2 = inlined_call_operand.hbm [shape: f32[1,1], index: 2, kind: output, shape index: {0}]   ;;  %s613_s3 = inlined_call_operand.hbm [shape: f32[1,1], index: 3, kind: output, shape index: {1}]  }
   0x1   :  { %10 = vsyncpa [#allocation5], 0  ;;  %s542_s12 = smov 0   ;;  %s544_s13 = smov 0  }
   0x2   :  { %s546_s14 = smov 0  }
   0x3 LB: > { %s374_s15 = sadd.s32 4294967295, %s517_s14   ;;  %s25_s16 = sadd.s32 1, %s513_s13  ;;  %s517_s14 = sphi %s546_s14, %s16_s14   ;;  %s513_s13 = sphi %s544_s13, %s616_s13   ;;  %s509_s12 = sphi %s542_s12, %s615_s12  }
   0x4   : > { %p26_p0 = scmp.ge.s32.totalorder %s25_s16, 2  ;;  %p378_p1 = scmp.ge.s32.totalorder %s517_s14, 1 }
   0x5   : > { %p158_p2 = scmp.lt.s32.totalorder %s517_s14, 3 }
   0x6   : > { %s618_s16 = smov (%p26_p0, %s25_s16), 0 }
   0x7   : > { %p159_p3 = pnand %p378_p1, %p158_p2 }
   0x8   : > { %p184_p4 = scmp.lt.s32.totalorder (!%p159_p3), %s509_s12, 1  ;;  %p197_p5 = scmp.eq.s32.totalorder (!%p159_p3), %s509_s12, 0 }
   0x9   : > { %162 = sbr.rel (%p159_p3) target bundleno = 231 (0xe7), region = 28 }
   0xe   : > { %s620_s12 = smov (!%p184_p4, %s509_s12), 1  ;;  %201 = sbr.rel (!%p197_p5) target bundleno = 19 (0x13), region = 32  ;;  %vm202_vm0 = vcmask (%p197_p5), 0   ;;  %v519_v0 = vmov (%p197_p5), 0.0  }
   0xf   : > { %s379_s17 = sshll.u32 %s620_s12, 2  ;;  %203 = vst.msk [vmem:[#allocation2] sm:$0x1] (%p197_p5), %vm202_vm0, %v519_v0 }
  0x10   : > { %s191_s20 = scalar_lea.vmem %s610_s0, %s379_s17  ;;  %204 = vst.msk [vmem:[#allocation4] sm:$0x1] (%p197_p5), %vm202_vm0, %v519_v0 }
  0x13 PF: > { %v205_v1 = vld [vmem:[%s191_s20] sm:$0xf]  ;;  %vm221_vm1 = vcmask 1040384   ;;  %s520_s23 = smov [#allocation2]   ;;  %s280_s27 = sshll.u32 %s612_s2, 4  ;;  %vm240_vm2 = vcmask 0   ;;  %s281_s27 = int_to_ptr.hbm [resolvable:$true] %s280_s27 }
  0x14   : > { %v206_v2 = vld [vmem:[%s611_s1] sm:$0xf]  ;;  %s278_s24 = sshll.u32 %s520_s23, 4  ;;  %p580_p6 = scmp.eq.s32.totalorder %s374_s15, 1  ;;  %s279_s24 = int_to_ptr.vmem [resolvable:$true] %s278_s24 }
  0x15   : > { %v207_v3 = vmul.f32 %v206_v2, %v205_v1  ;;  %s521_s30 = smov [#allocation4]   ;;  %s292_s7 = sshll.u32 %s613_s3, 4  ;;  %s293_s7 = int_to_ptr.hbm [resolvable:$true] %s292_s7 }
  0x16   : > { %v210_v44 = vld [vmem:[#allocation2] sm:$0x1]  ;;  %s290_s4 = sshll.u32 %s521_s30, 4  ;;  %s291_s4 = int_to_ptr.vmem [resolvable:$true] %s290_s4 }
  0x17   : > { %v208_v4 = vsub.f32 %v207_v3, %v206_v2  ;;  %v209_v5 = vsub.f32 %v205_v1, %v207_v3  ;;  %v242_v47 = vld [vmem:[#allocation4] sm:$0x1] }
  0x19   : > { %v211_v6 = vmul.f32 %v208_v4, %v208_v4  ;;  %v243_v7 = vmul.f32 %v209_v5, %v209_v5 }
  0x1b   : > { %v213_v8 = vperm.slane %v211_v6, 0  ;;  %v214_v9 = vperm.slane %v211_v6, 1  ;;  %v215_v10 = vperm.slane %v211_v6, 2  ;;  %v216_v11 = vperm.slane %v211_v6, 3 }
  0x1c   : > { %v245_v12 = vperm.slane %v243_v7, 0  ;;  %v246_v13 = vperm.slane %v243_v7, 1  ;;  %v247_v17 = vperm.slane %v243_v7, 2  ;;  %v248_v24 = vperm.slane %v243_v7, 3 }
  0x1d   : > { %v222_v14 = vsel %vm221_vm1, %v213_v8, 0.0  ;;  %v223_v15 = vsel %vm221_vm1, %v214_v9, 0.0  ;;  %v225_v16 = vsel %vm221_vm1, %v215_v10, 0.0  ;;  %v227_v21 = vsel %vm221_vm1, %v216_v11, 0.0 }
  0x1e   : > { %v224_v18 = vadd.f32 %v223_v15, %v222_v14  ;;  %v253_v19 = vsel %vm221_vm1, %v245_v12, 0.0  ;;  %v254_v20 = vsel %vm221_vm1, %v246_v13, 0.0  ;;  %v256_v25 = vsel %vm221_vm1, %v247_v17, 0.0 }
  0x1f   : > { %v255_v23 = vadd.f32 %v254_v20, %v253_v19  ;;  %v258_v28 = vsel %vm221_vm1, %v248_v24, 0.0 }
  0x20   : > { %v226_v22 = vadd.f32 %v225_v16, %v224_v18 }
  0x21   : > { %v257_v27 = vadd.f32 %v256_v25, %v255_v23 }
  0x22   : > { %v228_v26 = vadd.f32 %v227_v21, %v226_v22 }
  0x23   : > { %v259_v29 = vadd.f32 %v258_v28, %v257_v27 }
  0x24   : > { %229 = vadd.xlane.f32.xlu0 %v228_v26 }
  0x2c   : > { %260 = vadd.xlane.f32.xlu0 %v259_v29 }
  0x97   : > { %v230_v30 = vpop.xlane.xlu0 %229 }
  0x98   : > { %v231_v31 = vrot.slane %v230_v30, 4 }
  0x9a   : > { %v232_v32 = vadd.f32 %v231_v31, %v230_v30 }
  0x9c   : > { %v233_v33 = vrot.slane %v232_v32, 2 }
  0x9e   : > { %v234_v34 = vadd.f32 %v233_v33, %v232_v32 }
  0x9f   : > { %v261_v35 = vpop.xlane.xlu0 %260 }
  0xa0   : > { %v262_v36 = vrot.slane %v261_v35, 4  ;;  %v235_v37 = vrot.slane %v234_v34, 1 }
  0xa2   : > { %v263_v38 = vadd.f32 %v262_v36, %v261_v35  ;;  %v236_v39 = vadd.f32 %v235_v37, %v234_v34 }
  0xa4   : > { %v264_v40 = vrot.slane %v263_v38, 2  ;;  %388 = vpush %v236_v39 }
  0xa6   : > { %v265_v41 = vadd.f32 %v264_v40, %v263_v38 }
  0xa8   : > { %v266_v42 = vrot.slane %v265_v41, 1 }
  0xaa   : > { %v267_v43 = vadd.f32 %v266_v42, %v265_v41 }
  0xac   : > { %390 = vpush %v267_v43 }
  0xd5   : > { %s389_s28 = spop %388 }
  0xd6   : > { %v238_v45 = vstv %s389_s28 }
  0xd7   : > { %v239_v46 = vadd.f32 %v238_v45, %v210_v44 }
  0xd9   : > { %241 = vst.msk [vmem:[#allocation2] sm:$0x1] %vm240_vm2, %v239_v46 }
  0xda   : > { %393 = dma.vmem_to_hbm [thread:$0]  (%p580_p6), %s279_s24, 16, %s281_s27, [#allocation3]  }
  0xdd   : > { %s391_s8 = spop %390 }
  0xde   : > { %v269_v48 = vstv %s391_s8 }
  0xdf   : > { %v270_v49 = vadd.f32 %v269_v48, %v242_v47 }
  0xe1   : > { %271 = vst.msk [vmem:[#allocation4] sm:$0x1] %vm240_vm2, %v270_v49 }
  0xe2   : > { %395 = dma.vmem_to_hbm [thread:$0]  (%p580_p6), %s291_s4, 16, %s293_s7, [#allocation5]  }
  0xe3   : > { %500 = dma.done.wait (%p580_p6), [#allocation3], 16  }
  0xe4   : > { %502 = vsyncadd (%p580_p6), [#allocation3], 4294967280 }
  0xe5   : > { %504 = dma.done.wait (%p580_p6), [#allocation5], 16  }
  0xe6   : > { %506 = vsyncadd (%p580_p6), [#allocation5], 4294967280 }
  0xe7 PF: > { %s16_s14 = sadd.s32 1, %s517_s14   ;;  %s615_s12 = smov %s513_s13 }
  0xe8   : > { %p13_p7 = scmp.ge.s32.totalorder %s16_s14, 4   ;;  %s616_s13 = smov %s618_s16 }
  0xea   :  { %15 = sbr.rel (!%p13_p7) target bundleno = 3 (0x3), region = 70 }
  0xef   :  { %311 = vsyncpa [#allocation3], 1 }
  0xf0   :  { %313 = vsyncpa [#allocation3 + $0x1], 1 }
  0xf1   :  { %314 = vsyncpa [#allocation5], 1 }

</bundles_post_ra>
